<compile_context>
chip_gen: v7x
topology: tpu7x:2x2x1
jax: 0.10.0
libtpu: 0.0.40
codegen_flags: <defaults>
</compile_context>

<pallas_src>
import functools

import jax
import jax.numpy as jnp
from jax.experimental import pallas as pl
from jax.experimental.pallas import tpu as pltpu

INPUT_SIZE = 12
HIDDEN_SIZE = 256

SUBLANE = 8          # sublane alignment for the batch (M) dimension
MAX_BLOCK_B = 1024   # rows per batch block (keeps u_all ~1 MiB f32 per block)


def rnn_kernel(x_ref, wih_ref, whh_ref, b_ref, wfc_ref, bfc_ref, o_ref, *,
               seq_len, block_b):
    """One batch block: x_ref is time-major (T*block_b, I)."""
    T, Bb = seq_len, block_b
    mxu_dtype = whh_ref.dtype            # bf16 (fast MXU path) or f32 (exact)
    H = whh_ref.shape[0]

    # ---- hoisted input projection (off the serial h-dependence chain) ------
    # One well-shaped (T*Bb, I) @ (I, H) MXU matmul; combined bias added once.
    u_all = jnp.dot(x_ref[...], wih_ref[...],
                    preferred_element_type=jnp.float32) + b_ref[...]   # (T*Bb, H) f32

    whh = whh_ref[...]                                   # (H, H) = W_hh^T, loaded once
    h = jnp.zeros((Bb, H), jnp.float32)                  # h_0 = 0 (PyTorch default)

    # ---- serial recurrence: h_t = tanh(u_t + h_{t-1} @ W_hh^T) -------------
    # Per-step slices are contiguous and start at multiples of Bb (multiple of
    # 8 sublanes) -> zero-cost views.  MXU inputs may be bf16; accumulation,
    # bias add, hidden state and tanh stay f32 (v5e has no bf16 VPU/EUP).
    if T <= 64:
        # Short static T: full unroll gives the LLO scheduler full visibility
        # and removes all per-step loop overhead.
        for t in range(T):
            u_t = u_all[t * Bb:(t + 1) * Bb, :]                         # (Bb, H) f32
            h = jnp.tanh(u_t + jnp.dot(h.astype(mxu_dtype), whh,
                                       preferred_element_type=jnp.float32))
    else:
        # Long T: visible loop bounds code size and vreg live ranges.
        def step(t, h):
            u_t = jax.lax.dynamic_slice_in_dim(u_all, t * Bb, Bb, axis=0)
            return jnp.tanh(u_t + jnp.dot(h.astype(mxu_dtype), whh,
                                          preferred_element_type=jnp.float32))
        h = jax.lax.fori_loop(0, T, step, h)

    # ---- final projection: y = fc(output[:, -1, :]) = h_T @ W_fc^T + b_fc --
    y = jnp.dot(h.astype(mxu_dtype), wfc_ref[...],
                preferred_element_type=jnp.float32) + bfc_ref[...]      # (Bb, O) f32
    o_ref[...] = y.astype(o_ref.dtype)


def rnn_forward(x, w_ih, w_hh, b_ih, b_hh, w_fc, b_fc, *, use_bf16_weights=True):
    """x: (B, T, 12) -> (B, 12); same semantics as the PyTorch module."""
    B, T, I = x.shape
    H = w_hh.shape[0]
    O = w_fc.shape[0]

    mxu_dtype = jnp.bfloat16 if use_bf16_weights else x.dtype

    # --- batch padding / blocking (wrapper-side, tiny, effectively free) ----
    def round_up(a, m):
        return ((a + m - 1) // m) * m

    block_b = min(MAX_BLOCK_B, round_up(B, SUBLANE))
    B_pad = round_up(B, block_b)
    nb = B_pad // block_b

    x_pad = jnp.pad(x, ((0, B_pad - B), (0, 0), (0, 0)))               # (B_pad, T, I)
    # Time-major, batch-blocked slab: rows of block i at step t are contiguous
    # and 8-aligned inside the kernel.
    x_tm = (x_pad.reshape(nb, block_b, T, I)
                 .transpose(0, 2, 1, 3)                                 # (nb, T, block_b, I)
                 .reshape(nb, T * block_b, I)
                 .astype(mxu_dtype))

    wih_t = w_ih.T.astype(mxu_dtype)                     # (I, H)
    whh_t = w_hh.T.astype(mxu_dtype)                     # (H, H)
    wfc_t = w_fc.T.astype(mxu_dtype)                     # (H, O)
    b = (b_ih + b_hh).reshape(1, H).astype(jnp.float32)  # combined RNN bias, f32
    bfc = b_fc.reshape(1, O).astype(jnp.float32)         # fc bias, f32

    kernel = functools.partial(rnn_kernel, seq_len=T, block_b=block_b)

    out_pad = pl.pallas_call(
        kernel,
        out_shape=jax.ShapeDtypeStruct((B_pad, O), x.dtype),
        grid=(nb,),
        in_specs=[
            # x: one batch block per grid step, leading block axis squeezed.
            pl.BlockSpec((None, T * block_b, I), lambda i: (i, 0, 0)),
            # weights / biases: resident across the whole grid.
            pl.BlockSpec((I, H), lambda i: (0, 0)),
            pl.BlockSpec((H, H), lambda i: (0, 0)),
            pl.BlockSpec((1, H), lambda i: (0, 0)),
            pl.BlockSpec((H, O), lambda i: (0, 0)),
            pl.BlockSpec((1, O), lambda i: (0, 0)),
        ],
        out_specs=pl.BlockSpec((block_b, O), lambda i: (i, 0)),
        compiler_params=pltpu.CompilerParams(
            dimension_semantics=("parallel",)),   # batch blocks shard across v7x TCs
    )(x_tm, wih_t, whh_t, b, wfc_t, bfc)

    # Padded rows hold tanh(bias)-driven garbage; never returned.
    return out_pad[:B]


def reference_forward(x, w_ih, w_hh, b_ih, b_hh, w_fc, b_fc):
    """Pure-JAX f32 reference mirroring nn.RNN + nn.Linear."""
    B, T, _ = x.shape
    H = w_hh.shape[0]
    h = jnp.zeros((B, H), jnp.float32)
    for t in range(T):
        h = jnp.tanh(x[:, t, :] @ w_ih.T + b_ih + h @ w_hh.T + b_hh)
    return h @ w_fc.T + b_fc


if __name__ == "__main__":
    key = jax.random.PRNGKey(0)
    B, T = 2, 8

    k_x, k1, k2, k3, k4, k5, k6 = jax.random.split(key, 7)

    # PyTorch-style uniform(-1/sqrt(H), 1/sqrt(H)) parameter init
    bound = 1.0 / jnp.sqrt(jnp.float32(HIDDEN_SIZE))
    w_ih = jax.random.uniform(k1, (HIDDEN_SIZE, INPUT_SIZE), jnp.float32, -bound, bound)
    w_hh = jax.random.uniform(k2, (HIDDEN_SIZE, HIDDEN_SIZE), jnp.float32, -bound, bound)
    b_ih = jax.random.uniform(k3, (HIDDEN_SIZE,), jnp.float32, -bound, bound)
    b_hh = jax.random.uniform(k4, (HIDDEN_SIZE,), jnp.float32, -bound, bound)
    w_fc = jax.random.uniform(k5, (INPUT_SIZE, HIDDEN_SIZE), jnp.float32, -bound, bound)
    b_fc = jax.random.uniform(k6, (INPUT_SIZE,), jnp.float32, -bound, bound)

    # synthetic input standing in for the CSV (batch of sequences, 12 features)
    x = jax.random.normal(k_x, (B, T, INPUT_SIZE), jnp.float32)

    ref = reference_forward(x, w_ih, w_hh, b_ih, b_hh, w_fc, b_fc)

    # 1) exact-semantics check: f32 weights into the MXU
    out_f32 = jax.block_until_ready(
        rnn_forward(x, w_ih, w_hh, b_ih, b_hh, w_fc, b_fc, use_bf16_weights=False))
    assert out_f32.shape == (B, INPUT_SIZE)
    assert jnp.allclose(out_f32, ref, atol=1e-5, rtol=1e-5)

    # 2) optimized default: bf16 MXU inputs, f32 accumulation/hidden/tanh
    # NOTE: bf16 W_hh compounds rounding error over timesteps; for long T or
    # strict accuracy use use_bf16_weights=False.
    out = jax.block_until_ready(
        rnn_forward(x, w_ih, w_hh, b_ih, b_hh, w_fc, b_fc, use_bf16_weights=True))
    assert out.shape == (B, INPUT_SIZE)
    assert jnp.allclose(out, ref, atol=2e-2, rtol=2e-2)

    print("KERNEL_OK")
</pallas_src>

<mosaic_0001>
module attributes {stable_mosaic.version = 11 : i64} {
  func.func @rnn_kernel(%arg0: i32, %arg1: memref<1x64x12xf32, #tpu.memory_space<vmem>>, %arg2: memref<12x256xf32, #tpu.memory_space<vmem>>, %arg3: memref<256x256xf32, #tpu.memory_space<vmem>>, %arg4: memref<1x256xf32, #tpu.memory_space<vmem>>, %arg5: memref<256x12xf32, #tpu.memory_space<vmem>>, %arg6: memref<1x12xf32, #tpu.memory_space<vmem>>, %arg7: memref<8x12xf32, #tpu.memory_space<vmem>>) attributes {dimension_semantics = [#tpu.dimension_semantics<parallel>], iteration_bounds = array<i64: 1>, scalar_prefetch = 0 : i64, scratch_operands = 0 : i64, tpu.core_type = #tpu.core_type<tc>, window_params = [{transform_indices = @transform_0, window_bounds = array<i64: 1, 64, 12>}, {pipeline_mode = #tpu.pipeline_mode<synchronous>, transform_indices = @transform_1, window_bounds = array<i64: 12, 256>}, {pipeline_mode = #tpu.pipeline_mode<synchronous>, transform_indices = @transform_2, window_bounds = array<i64: 256, 256>}, {pipeline_mode = #tpu.pipeline_mode<synchronous>, transform_indices = @transform_3, window_bounds = array<i64: 1, 256>}, {pipeline_mode = #tpu.pipeline_mode<synchronous>, transform_indices = @transform_4, window_bounds = array<i64: 256, 12>}, {pipeline_mode = #tpu.pipeline_mode<synchronous>, transform_indices = @transform_5, window_bounds = array<i64: 1, 12>}, {transform_indices = @transform_6, window_bounds = array<i64: 8, 12>}]} {
    %c0 = arith.constant 0 : index
    %c0_0 = arith.constant 0 : index
    %c0_1 = arith.constant 0 : index
    %0 = vector.load %arg1[%c0, %c0_0, %c0_1] : memref<1x64x12xf32, #tpu.memory_space<vmem>>, vector<1x64x12xf32>
    %1 = vector.shape_cast %0 : vector<1x64x12xf32> to vector<64x12xf32>
    %c0_2 = arith.constant 0 : index
    %c0_3 = arith.constant 0 : index
    %2 = vector.load %arg2[%c0_2, %c0_3] : memref<12x256xf32, #tpu.memory_space<vmem>>, vector<12x256xf32>
    %cst = arith.constant dense<0.000000e+00> : vector<64x256xf32>
    %3 = tpu.matmul %1, %2, %cst {dimension_numbers = #tpu.dot_dimension_numbers<[1], [0], [0], [1], [0, 0, 1, 1], [], []>} : vector<64x12xf32>, vector<12x256xf32>, vector<64x256xf32> -> vector<64x256xf32>
    %c0_4 = arith.constant 0 : index
    %c0_5 = arith.constant 0 : index
    %4 = vector.load %arg4[%c0_4, %c0_5] : memref<1x256xf32, #tpu.memory_space<vmem>>, vector<1x256xf32>
    %5 = vector.broadcast %4 : vector<1x256xf32> to vector<64x256xf32>
    %6 = arith.addf %3, %5 : vector<64x256xf32>
    %c0_6 = arith.constant 0 : index
    %c0_7 = arith.constant 0 : index
    %7 = vector.load %arg3[%c0_6, %c0_7] : memref<256x256xf32, #tpu.memory_space<vmem>>, vector<256x256xf32>
    %cst_8 = arith.constant 0.000000e+00 : f32
    %8 = vector.broadcast %cst_8 : f32 to vector<8x256xf32>
    %9 = vector.extract_strided_slice %6 {offsets = [0, 0], sizes = [8, 256], strides = [1, 1]} : vector<64x256xf32> to vector<8x256xf32>
    %cst_9 = arith.constant dense<0.000000e+00> : vector<8x256xf32>
    %10 = tpu.matmul %8, %7, %cst_9 {dimension_numbers = #tpu.dot_dimension_numbers<[1], [0], [0], [1], [0, 0, 1, 1], [], []>} : vector<8x256xf32>, vector<256x256xf32>, vector<8x256xf32> -> vector<8x256xf32>
    %11 = arith.addf %9, %10 : vector<8x256xf32>
    %12 = math.tanh %11 : vector<8x256xf32>
    %13 = vector.extract_strided_slice %6 {offsets = [8, 0], sizes = [8, 256], strides = [1, 1]} : vector<64x256xf32> to vector<8x256xf32>
    %cst_10 = arith.constant dense<0.000000e+00> : vector<8x256xf32>
    %14 = tpu.matmul %12, %7, %cst_10 {dimension_numbers = #tpu.dot_dimension_numbers<[1], [0], [0], [1], [0, 0, 1, 1], [], []>} : vector<8x256xf32>, vector<256x256xf32>, vector<8x256xf32> -> vector<8x256xf32>
    %15 = arith.addf %13, %14 : vector<8x256xf32>
    %16 = math.tanh %15 : vector<8x256xf32>
    %17 = vector.extract_strided_slice %6 {offsets = [16, 0], sizes = [8, 256], strides = [1, 1]} : vector<64x256xf32> to vector<8x256xf32>
    %cst_11 = arith.constant dense<0.000000e+00> : vector<8x256xf32>
    %18 = tpu.matmul %16, %7, %cst_11 {dimension_numbers = #tpu.dot_dimension_numbers<[1], [0], [0], [1], [0, 0, 1, 1], [], []>} : vector<8x256xf32>, vector<256x256xf32>, vector<8x256xf32> -> vector<8x256xf32>
    %19 = arith.addf %17, %18 : vector<8x256xf32>
    %20 = math.tanh %19 : vector<8x256xf32>
    %21 = vector.extract_strided_slice %6 {offsets = [24, 0], sizes = [8, 256], strides = [1, 1]} : vector<64x256xf32> to vector<8x256xf32>
    %cst_12 = arith.constant dense<0.000000e+00> : vector<8x256xf32>
    %22 = tpu.matmul %20, %7, %cst_12 {dimension_numbers = #tpu.dot_dimension_numbers<[1], [0], [0], [1], [0, 0, 1, 1], [], []>} : vector<8x256xf32>, vector<256x256xf32>, vector<8x256xf32> -> vector<8x256xf32>
    %23 = arith.addf %21, %22 : vector<8x256xf32>
    %24 = math.tanh %23 : vector<8x256xf32>
    %25 = vector.extract_strided_slice %6 {offsets = [32, 0], sizes = [8, 256], strides = [1, 1]} : vector<64x256xf32> to vector<8x256xf32>
    %cst_13 = arith.constant dense<0.000000e+00> : vector<8x256xf32>
    %26 = tpu.matmul %24, %7, %cst_13 {dimension_numbers = #tpu.dot_dimension_numbers<[1], [0], [0], [1], [0, 0, 1, 1], [], []>} : vector<8x256xf32>, vector<256x256xf32>, vector<8x256xf32> -> vector<8x256xf32>
    %27 = arith.addf %25, %26 : vector<8x256xf32>
    %28 = math.tanh %27 : vector<8x256xf32>
    %29 = vector.extract_strided_slice %6 {offsets = [40, 0], sizes = [8, 256], strides = [1, 1]} : vector<64x256xf32> to vector<8x256xf32>
    %cst_14 = arith.constant dense<0.000000e+00> : vector<8x256xf32>
    %30 = tpu.matmul %28, %7, %cst_14 {dimension_numbers = #tpu.dot_dimension_numbers<[1], [0], [0], [1], [0, 0, 1, 1], [], []>} : vector<8x256xf32>, vector<256x256xf32>, vector<8x256xf32> -> vector<8x256xf32>
    %31 = arith.addf %29, %30 : vector<8x256xf32>
    %32 = math.tanh %31 : vector<8x256xf32>
    %33 = vector.extract_strided_slice %6 {offsets = [48, 0], sizes = [8, 256], strides = [1, 1]} : vector<64x256xf32> to vector<8x256xf32>
    %cst_15 = arith.constant dense<0.000000e+00> : vector<8x256xf32>
    %34 = tpu.matmul %32, %7, %cst_15 {dimension_numbers = #tpu.dot_dimension_numbers<[1], [0], [0], [1], [0, 0, 1, 1], [], []>} : vector<8x256xf32>, vector<256x256xf32>, vector<8x256xf32> -> vector<8x256xf32>
    %35 = arith.addf %33, %34 : vector<8x256xf32>
    %36 = math.tanh %35 : vector<8x256xf32>
    %37 = vector.extract_strided_slice %6 {offsets = [56, 0], sizes = [8, 256], strides = [1, 1]} : vector<64x256xf32> to vector<8x256xf32>
    %cst_16 = arith.constant dense<0.000000e+00> : vector<8x256xf32>
    %38 = tpu.matmul %36, %7, %cst_16 {dimension_numbers = #tpu.dot_dimension_numbers<[1], [0], [0], [1], [0, 0, 1, 1], [], []>} : vector<8x256xf32>, vector<256x256xf32>, vector<8x256xf32> -> vector<8x256xf32>
    %39 = arith.addf %37, %38 : vector<8x256xf32>
    %40 = math.tanh %39 : vector<8x256xf32>
    %c0_17 = arith.constant 0 : index
    %c0_18 = arith.constant 0 : index
    %41 = vector.load %arg5[%c0_17, %c0_18] : memref<256x12xf32, #tpu.memory_space<vmem>>, vector<256x12xf32>
    %cst_19 = arith.constant dense<0.000000e+00> : vector<8x12xf32>
    %42 = tpu.matmul %40, %41, %cst_19 {dimension_numbers = #tpu.dot_dimension_numbers<[1], [0], [0], [1], [0, 0, 1, 1], [], []>} : vector<8x256xf32>, vector<256x12xf32>, vector<8x12xf32> -> vector<8x12xf32>
    %c0_20 = arith.constant 0 : index
    %c0_21 = arith.constant 0 : index
    %43 = vector.load %arg6[%c0_20, %c0_21] : memref<1x12xf32, #tpu.memory_space<vmem>>, vector<1x12xf32>
    %44 = vector.broadcast %43 : vector<1x12xf32> to vector<8x12xf32>
    %45 = arith.addf %42, %44 : vector<8x12xf32>
    %c0_22 = arith.constant 0 : index
    %c0_23 = arith.constant 0 : index
    %46 = vector.load %arg7[%c0_22, %c0_23] : memref<8x12xf32, #tpu.memory_space<vmem>>, vector<8x12xf32>
    tpu.vector_store %arg7[%c0_22, %c0_23], %45 {strides = array<i32>} : memref<8x12xf32, #tpu.memory_space<vmem>>, vector<8x12xf32>,
    return
  }
  func.func @transform_0(%arg0: i32) -> (i32, i32, i32) {
    %c0_i32 = arith.constant 0 : i32
    %c0_i32_0 = arith.constant 0 : i32
    %c0_i32_1 = arith.constant 0 : i32
    return %arg0, %c0_i32, %c0_i32_0 : i32, i32, i32
  }
  func.func @transform_1(%arg0: i32) -> (i32, i32) {
    %c0_i32 = arith.constant 0 : i32
    %c0_i32_0 = arith.constant 0 : i32
    %c0_i32_1 = arith.constant 0 : i32
    return %c0_i32, %c0_i32_0 : i32, i32
  }
  func.func @transform_2(%arg0: i32) -> (i32, i32) {
    %c0_i32 = arith.constant 0 : i32
    %c0_i32_0 = arith.constant 0 : i32
    %c0_i32_1 = arith.constant 0 : i32
    return %c0_i32, %c0_i32_0 : i32, i32
  }
  func.func @transform_3(%arg0: i32) -> (i32, i32) {
    %c0_i32 = arith.constant 0 : i32
    %c0_i32_0 = arith.constant 0 : i32
    %c0_i32_1 = arith.constant 0 : i32
    return %c0_i32, %c0_i32_0 : i32, i32
  }
  func.func @transform_4(%arg0: i32) -> (i32, i32) {
    %c0_i32 = arith.constant 0 : i32
    %c0_i32_0 = arith.constant 0 : i32
    %c0_i32_1 = arith.constant 0 : i32
    return %c0_i32, %c0_i32_0 : i32, i32
  }
  func.func @transform_5(%arg0: i32) -> (i32, i32) {
    %c0_i32 = arith.constant 0 : i32
    %c0_i32_0 = arith.constant 0 : i32
    %c0_i32_1 = arith.constant 0 : i32
    return %c0_i32, %c0_i32_0 : i32, i32
  }
  func.func @transform_6(%arg0: i32) -> (i32, i32) {
    %c0_i32 = arith.constant 0 : i32
    %c0_i32_0 = arith.constant 0 : i32
    return %arg0, %c0_i32 : i32, i32
  }
}

</mosaic_0001>

<bundles_post_ra>
// kernel: tpu_custom_call.1
= control target key start
LH: loop header
LB: loop body
LE: loop exit
PB: predicated region body
PF: predicated region fallthrough
CT: control target
= control target key end

     0   :  { %11 = vsyncpa [#allocation3], 0  ;;  %s2280_s0 = inlined_call_operand.vmem [shape: f32[1,64,12], index: 0, kind: input, shape index: {}]   ;;  %s2281_s1 = inlined_call_operand.vmem [shape: f32[12,256], index: 1, kind: input, shape index: {}]   ;;  %s2282_s2 = inlined_call_operand.hbm [shape: f32[256,256], index: 2, kind: input, shape index: {}]   ;;  %s2283_s3 = inlined_call_operand.vmem [shape: f32[1,256], index: 3, kind: input, shape index: {}]   ;;  %s2284_s4 = inlined_call_operand.vmem [shape: f32[256,12], index: 4, kind: input, shape index: {}]   ;;  %s2285_s5 = inlined_call_operand.vmem [shape: f32[1,12], index: 5, kind: input, shape index: {}]   ;;  %s2286_s6 = inlined_call_operand.hbm [shape: f32[8,12], index: 6, kind: output, shape index: {}]  }
   0x1   :  { %12 = vsyncpa [#allocation4], 0  ;;  %s1710_s21 = smov [#allocation2]   ;;  %s1662_s25 = scalar_lea.hbm %s2282_s2, 8192 }
   0x2   :  { %s22_s22 = sshll.u32 %s1710_s21, 4  ;;  %p1663_p0 = scmp.ne.s32.totalorder %s2282_s2, %s1662_s25  ;;  %s23_s22 = int_to_ptr.vmem [resolvable:$true] %s22_s22 }
   0x3   :  { %p1666_p1 = scmp.lt.u32.totalorder %s1662_s25, %s2282_s2 }
   0x5   :  { %p1668_p2 = pnand %p1666_p1, %p1663_p0 }
   0x7   :  { %1671 = shalt.err (!%p1668_p2)
}
   0x8   :  { %s1672_s30 = scalar_lea.vmem %s23_s22, 8192  ;;  %p1677_p4 = scmp.lt.s32.totalorder %s23_s22, %s23_s22 }
   0x9   :  { %p1673_p3 = scmp.ne.s32.totalorder %s23_s22, %s1672_s30  ;;  %p1678_p5 = scmp.lt.s32.totalorder %s1672_s30, %s1672_s30 }
   0xb   :  { %p1679_p6 = por %p1678_p5, %p1677_p4 }
   0xd   :  { %p1680_p7 = pnand %p1679_p6, %p1673_p3 }
   0xf   :  { %1683 = shalt.err (!%p1680_p7)
}
  0x10   :  { %s1711_s7 = smov 256   ;;  %s1712_s8 = smov 16  }
  0x11   :  { %28 = dma.hbm_to_vmem [thread:$0]  %s2282_s2, 8192, %s23_s22, [#allocation3], %s1711_s7, %s1711_s7, %s1712_s8  }
  0x12   :  { %1706 = dma.done.wait [#allocation3], 8192  }
  0x13   :  { %1707 = vsyncadd [#allocation3], 4294959104  ;;  %v1713_v0 = vmov 0.0   ;;  %v208_v1 = vld [vmem:[#allocation2 + $0x8] sm:$0xff]  ;;  %v210_v2 = vld [vmem:[#allocation2 + $0x18] sm:$0xff]  ;;  %vm87_vm0 = vcmask 1043456  }
  0x14   :  { %158 = vmatprep.mubr.f32.mxu0 %v1713_v0  ;;  %335 = vmatprep.mubr.f32.mxu1 %v1713_v0  ;;  %v207_v3 = vld [vmem:[#allocation2] sm:$0xff]  ;;  %v1765_v4 = vpack.c.bf16 %v210_v2, %v208_v1  ;;  %v209_v5 = vld [vmem:[#allocation2 + $0x10] sm:$0xff]  ;;  %v212_v6 = vld [vmem:[#allocation2 + $0x28] sm:$0xff]  ;;  %vm1714_vm1 = vmmov 1   ;;  %vm62_vm3 = vcmask 97280   ;;  %s1715_s17 = smov [#allocation5]  }
  0x15   :  { %v214_v7 = vld [vmem:[#allocation2 + $0x38] sm:$0xff]  ;;  %v1767_v8 = vpack.c.bf16 %v209_v5, %v207_v3  ;;  %v211_v10 = vld [vmem:[#allocation2 + $0x20] sm:$0xff]  ;;  %v213_v11 = vld [vmem:[#allocation2 + $0x30] sm:$0xff]  ;;  %s987_s18 = sshll.u32 %s1715_s17, 4  ;;  %s988_s18 = int_to_ptr.vmem [resolvable:$true] %s987_s18 }
  0x16   :  { %v1769_v9 = vpack.c.bf16 %v214_v7, %v212_v6  ;;  %v216_v12 = vld [vmem:[#allocation2 + $0x48] sm:$0xff]  ;;  %1049 = vmatprep.subr.bf16.mxu1 %v1765_v4  ;;  %v218_v13 = vld [vmem:[#allocation2 + $0x58] sm:$0xff]  ;;  %v1773_v14 = vpack.c.bf16 %v213_v11, %v211_v10  ;;  %v215_v16 = vld [vmem:[#allocation2 + $0x40] sm:$0xff]  ;;  %s1684_s19 = scalar_lea.vmem %s988_s18, 128  ;;  %p1689_p9 = scmp.lt.s32.totalorder %s988_s18, %s988_s18 }
  0x17   :  { %1051 = vmatpush1.bf16.msra.mxu1 %v1767_v8  ;;  %v1776_v15 = vpack.c.bf16 %v218_v13, %v216_v12  ;;  %v217_v17 = vld [vmem:[#allocation2 + $0x50] sm:$0xff]  ;;  %v220_v18 = vld [vmem:[#allocation2 + $0x68] sm:$0xff]  ;;  %v222_v19 = vld [vmem:[#allocation2 + $0x78] sm:$0xff]  ;;  %p1685_p8 = scmp.ne.s32.totalorder %s988_s18, %s1684_s19  ;;  %p1690_p10 = scmp.lt.s32.totalorder %s1684_s19, %s1684_s19 }
  0x18   :  { %1053 = vmatprep.subr.bf16.mxu1 %v1769_v9  ;;  %v1779_v20 = vpack.c.bf16 %v217_v17, %v215_v16  ;;  %v1782_v21 = vpack.c.bf16 %v222_v19, %v220_v18  ;;  %v219_v22 = vld [vmem:[#allocation2 + $0x60] sm:$0xff]  ;;  %v221_v23 = vld [vmem:[#allocation2 + $0x70] sm:$0xff]  ;;  %v224_v24 = vld [vmem:[#allocation2 + $0x88] sm:$0xff] }
  0x19   :  { %v226_v25 = vld [vmem:[#allocation2 + $0x98] sm:$0xff]  ;;  %v1785_v26 = vpack.c.bf16 %v221_v23, %v219_v22  ;;  %v223_v28 = vld [vmem:[#allocation2 + $0x80] sm:$0xff]  ;;  %v225_v29 = vld [vmem:[#allocation2 + $0x90] sm:$0xff]  ;;  %p1691_p11 = por %p1690_p10, %p1689_p9 }
  0x1a   :  { %v1788_v27 = vpack.c.bf16 %v226_v25, %v224_v24  ;;  %v228_v30 = vld [vmem:[#allocation2 + $0xa8] sm:$0xff]  ;;  %v230_v31 = vld [vmem:[#allocation2 + $0xb8] sm:$0xff]  ;;  %v1791_v32 = vpack.c.bf16 %v225_v29, %v223_v28  ;;  %v227_v34 = vld [vmem:[#allocation2 + $0xa0] sm:$0xff] }
  0x1b   :  { %1055 = vmatpush1.bf16.msra.mxu1 %v1773_v14  ;;  %v1794_v33 = vpack.c.bf16 %v230_v31, %v228_v30  ;;  %v229_v35 = vld [vmem:[#allocation2 + $0xb0] sm:$0xff]  ;;  %v232_v36 = vld [vmem:[#allocation2 + $0xc8] sm:$0xff]  ;;  %v234_v37 = vld [vmem:[#allocation2 + $0xd8] sm:$0xff]  ;;  %p1692_p12 = pnand %p1691_p11, %p1685_p8 }
  0x1c   :  { %1057 = vmatprep.subr.bf16.mxu1 %v1776_v15  ;;  %v47_v38 = vld [vmem:[%s2281_s1 + $0x8] sm:$0xff]  ;;  %v49_v39 = vld [vmem:[%s2281_s1 + $0x18] sm:$0xf]  ;;  %vm1802_vm2 = vmpackc.low %vm87_vm0, %vm1714_vm1  ;;  %v1807_v41 = vpack.c.bf16 %v229_v35, %v227_v34  ;;  %v1813_v44 = vpack.c.bf16 %v234_v37, %v232_v36 }
  0x1d   :  { %v1042_v42 = vpack.c.bf16 %v49_v39, %v47_v38  ;;  %v46_v43 = vld [vmem:[%s2281_s1] sm:$0xff]  ;;  %v233_v46 = vld [vmem:[#allocation2 + $0xd0] sm:$0xff]  ;;  %v236_v48 = vld [vmem:[#allocation2 + $0xe8] sm:$0xff] }
  0x1e   :  { %v231_v45 = vld [vmem:[#allocation2 + $0xc0] sm:$0xff]  ;;  %v48_v47 = vld [vmem:[%s2281_s1 + $0x10] sm:$0xf]  ;;  %v238_v49 = vld [vmem:[#allocation2 + $0xf8] sm:$0xff] }
  0x1f   :  { %1059 = vmatpush1.bf16.msra.mxu1 %v1779_v20  ;;  %1044 = vmatprep.subr.msk.bf16.mxu0 %vm1802_vm2, %v1042_v42  ;;  %v1045_v50 = vpack.c.bf16 %v48_v47, %v46_v43  ;;  %v1821_v51 = vpack.c.bf16 %v233_v46, %v231_v45  ;;  %v38_v52 = vld [vmem:[%s2280_s0] sm:$0xff]  ;;  %v1829_v53 = vpack.c.bf16 %v238_v49, %v236_v48  ;;  %v237_v55 = vld [vmem:[#allocation2 + $0xf0] sm:$0xff]  ;;  %v240_v56 = vld [vmem:[#allocation2 + $0x108] sm:$0xff] }
  0x20   :  { %1061 = vmatprep.subr.bf16.mxu1 %v1782_v21  ;;  %v235_v54 = vld [vmem:[#allocation2 + $0xe0] sm:$0xff]  ;;  %v242_v57 = vld [vmem:[#allocation2 + $0x118] sm:$0xff]  ;;  %v241_v61 = vld [vmem:[#allocation2 + $0x110] sm:$0xff] }
  0x21   :  { %1047 = vmatpush1.bf16.msk.msra.mxu0 %vm1802_vm2, %v1045_v50  ;;  %v1834_v58 = vpack.c.bf16 %v237_v55, %v235_v54  ;;  %v1838_v59 = vpack.c.bf16 %v242_v57, %v240_v56  ;;  %v239_v60 = vld [vmem:[#allocation2 + $0x100] sm:$0xff]  ;;  %v244_v62 = vld [vmem:[#allocation2 + $0x128] sm:$0xff]  ;;  %v246_v63 = vld [vmem:[#allocation2 + $0x138] sm:$0xff] }
  0x22   :  { %1305 = vmatprep.subr.bf16.mxu0 %v1765_v4  ;;  %v1843_v1 = vpack.c.bf16 %v241_v61, %v239_v60  ;;  %v1846_v2 = vpack.c.bf16 %v246_v63, %v244_v62  ;;  %v243_v3 = vld [vmem:[#allocation2 + $0x120] sm:$0xff]  ;;  %v245_v5 = vld [vmem:[#allocation2 + $0x130] sm:$0xff]  ;;  %v248_v6 = vld [vmem:[#allocation2 + $0x148] sm:$0xff]  ;;  %v52_v62 = vlaneseq }
  0x23   :  { %1063 = vmatpush1.bf16.msra.mxu1 %v1785_v26  ;;  %v250_v7 = vld [vmem:[#allocation2 + $0x158] sm:$0xff]  ;;  %v1851_v10 = vpack.c.bf16 %v245_v5, %v243_v3  ;;  %v247_v12 = vld [vmem:[#allocation2 + $0x140] sm:$0xff]  ;;  %v249_v13 = vld [vmem:[#allocation2 + $0x150] sm:$0xff] }
  0x24   :  { %1065 = vmatprep.subr.bf16.mxu1 %v1788_v27  ;;  %998 = vmatmul.mubr.msk.f32.vlgmr.msra.gmra.mrb[0].mxu0 %vm62_vm3, %v38_v52  ;;  %v1854_v11 = vpack.c.bf16 %v250_v7, %v248_v6  ;;  %v252_v16 = vld [vmem:[#allocation2 + $0x168] sm:$0xff]  ;;  %v254_v17 = vld [vmem:[#allocation2 + $0x178] sm:$0xff]  ;;  %v1859_v18 = vpack.c.bf16 %v249_v13, %v247_v12  ;;  %v251_v22 = vld [vmem:[#allocation2 + $0x160] sm:$0xff]  ;;  %v53_v63 = vshrl.u32 %v52_v62, 7 }
  0x25   :  { %164 = vmatprep.mubr.f32.mxu0 %v1713_v0  ;;  %1307 = vmatpush1.bf16.msra.mxu0 %v1767_v8  ;;  %v1862_v19 = vpack.c.bf16 %v254_v17, %v252_v16  ;;  %v253_v23 = vld [vmem:[#allocation2 + $0x170] sm:$0xff]  ;;  %v256_v24 = vld [vmem:[#allocation2 + $0x188] sm:$0xff]  ;;  %v258_v25 = vld [vmem:[#allocation2 + $0x198] sm:$0xff] }
  0x26   :  { %1309 = vmatprep.subr.bf16.mxu0 %v1769_v9  ;;  %v1867_v28 = vpack.c.bf16 %v253_v23, %v251_v22  ;;  %v1870_v29 = vpack.c.bf16 %v258_v25, %v256_v24  ;;  %v255_v30 = vld [vmem:[#allocation2 + $0x180] sm:$0xff]  ;;  %v257_v31 = vld [vmem:[#allocation2 + $0x190] sm:$0xff]  ;;  %v260_v34 = vld [vmem:[#allocation2 + $0x1a8] sm:$0xff]  ;;  %v54_v3 = vsub.s32 0, %v53_v63  ;;  %v58_v6 = vsub.s32 1, %v53_v63 }
  0x27   :  { %1067 = vmatpush1.bf16.msra.mxu1 %v1791_v32  ;;  %v262_v35 = vld [vmem:[#allocation2 + $0x1b8] sm:$0xff]  ;;  %v1875_v36 = vpack.c.bf16 %v257_v31, %v255_v30  ;;  %v259_v38 = vld [vmem:[#allocation2 + $0x1a0] sm:$0xff]  ;;  %v261_v39 = vld [vmem:[#allocation2 + $0x1b0] sm:$0xff] }
  0x28   :  { %1069 = vmatprep.subr.bf16.mxu1 %v1794_v33  ;;  %v1878_v37 = vpack.c.bf16 %v262_v35, %v260_v34  ;;  %v264_v40 = vld [vmem:[#allocation2 + $0x1c8] sm:$0xff]  ;;  %v266_v42 = vld [vmem:[#allocation2 + $0x1d8] sm:$0xff]  ;;  %v1883_v43 = vpack.c.bf16 %v261_v39, %v259_v38  ;;  %v263_v46 = vld [vmem:[#allocation2 + $0x1c0] sm:$0xff] }
  0x29   :  { %1311 = vmatpush1.bf16.msra.mxu0 %v1773_v14  ;;  %v1886_v45 = vpack.c.bf16 %v266_v42, %v264_v40  ;;  %v265_v47 = vld [vmem:[#allocation2 + $0x1d0] sm:$0xff]  ;;  %v268_v48 = vld [vmem:[#allocation2 + $0x1e8] sm:$0xff]  ;;  %v270_v49 = vld [vmem:[#allocation2 + $0x1f8] sm:$0xff] }
  0x2a   :  { %1313 = vmatprep.subr.bf16.mxu0 %v1776_v15  ;;  %v1891_v50 = vpack.c.bf16 %v265_v47, %v263_v46  ;;  %v1894_v52 = vpack.c.bf16 %v270_v49, %v268_v48  ;;  %v267_v54 = vld [vmem:[#allocation2 + $0x1e0] sm:$0xff]  ;;  %v269_v55 = vld [vmem:[#allocation2 + $0x1f0] sm:$0xff]  ;;  %v39_v57 = vld [vmem:[%s2280_s0 + $0x8] sm:$0xff] }
  0x2b   :  { %1071 = vmatpush1.bf16.msra.mxu1 %v1807_v41  ;;  %v1899_v56 = vpack.c.bf16 %v269_v55, %v267_v54  ;;  %999 = vmatmul.mubr.msk.f32.gmra.mrb[2].mxu0 %vm62_vm3, %v39_v57  ;;  %v50_v5 = vld [vmem:[%s2283_s3] sm:$0x3]  ;;  %v40_v35 = vld [vmem:[%s2280_s0 + $0x10] sm:$0xff]  ;;  %v41_v57 = vld [vmem:[%s2280_s0 + $0x18] sm:$0xff] }
  0x2c   :  { %1073 = vmatprep.subr.bf16.mxu1 %v1813_v44  ;;  %170 = vmatprep.mubr.f32.mxu0 %v1713_v0  ;;  %v1961_v7 = vrot.slane %v50_v5, %v54_v3  ;;  %v1963_v12 = vrot.slane %v50_v5, %v58_v6 }
  0x2d   :  { %1315 = vmatpush1.bf16.msra.mxu0 %v1779_v20 }
  0x2e   :  { %1317 = vmatprep.subr.bf16.mxu0 %v1782_v21 }
  0x2f   :  { %1075 = vmatpush1.bf16.msra.mxu1 %v1821_v51  ;;  %1000 = vmatmul.mubr.msk.f32.gmra.mrb[4].mxu0 %vm62_vm3, %v40_v35 }
  0x30   :  { %1077 = vmatprep.subr.bf16.mxu1 %v1829_v53  ;;  %176 = vmatprep.mubr.f32.mxu0 %v1713_v0 }
  0x31   :  { %1319 = vmatpush1.bf16.msra.mxu0 %v1785_v26 }
  0x32   :  { %1321 = vmatprep.subr.bf16.mxu0 %v1788_v27 }
  0x33   :  { %1079 = vmatpush1.bf16.msra.mxu1 %v1834_v58  ;;  %1001 = vmatmul.mubr.msk.f32.gmra.mrb[6].mxu0 %vm62_vm3, %v41_v57 }
  0x34   :  { %1081 = vmatprep.subr.bf16.mxu1 %v1838_v59  ;;  %182 = vmatprep.mubr.f32.mxu0 %v1713_v0 }
  0x35   :  { %1323 = vmatpush1.bf16.msra.mxu0 %v1791_v32 }
  0x36   :  { %1325 = vmatprep.subr.bf16.mxu0 %v1794_v33 }
  0x37   :  { %1083 = vmatpush1.bf16.msra.mxu1 %v1843_v1 }
  0x38   :  { %1085 = vmatprep.subr.bf16.mxu1 %v1846_v2 }
  0x39   :  { %1327 = vmatpush1.bf16.msra.mxu0 %v1807_v41 }
  0x3a   :  { %1329 = vmatprep.subr.bf16.mxu0 %v1813_v44 }
  0x3b   :  { %1087 = vmatpush1.bf16.msra.mxu1 %v1851_v10 }
  0x3c   :  { %1089 = vmatprep.subr.bf16.mxu1 %v1854_v11 }
  0x3d   :  { %1331 = vmatpush1.bf16.msra.mxu0 %v1821_v51 }
  0x3e   :  { %1333 = vmatprep.subr.bf16.mxu0 %v1829_v53 }
  0x3f   :  { %1091 = vmatpush1.bf16.msra.mxu1 %v1859_v18 }
  0x40   :  { %1093 = vmatprep.subr.bf16.mxu1 %v1862_v19 }
  0x41   :  { %1335 = vmatpush1.bf16.msra.mxu0 %v1834_v58 }
  0x42   :  { %1337 = vmatprep.subr.bf16.mxu0 %v1838_v59 }
  0x43   :  { %1095 = vmatpush1.bf16.msra.mxu1 %v1867_v28 }
  0x44   :  { %1097 = vmatprep.subr.bf16.mxu1 %v1870_v29 }
  0x45   :  { %1339 = vmatpush1.bf16.msra.mxu0 %v1843_v1 }
  0x46   :  { %1341 = vmatprep.subr.bf16.mxu0 %v1846_v2 }
  0x47   :  { %1099 = vmatpush1.bf16.msra.mxu1 %v1875_v36 }
  0x48   :  { %1101 = vmatprep.subr.bf16.mxu1 %v1878_v37 }
  0x49   :  { %1343 = vmatpush1.bf16.msra.mxu0 %v1851_v10 }
  0x4a   :  { %1345 = vmatprep.subr.bf16.mxu0 %v1854_v11 }
  0x4b   :  { %1103 = vmatpush1.bf16.msra.mxu1 %v1883_v43 }
  0x4c   :  { %1105 = vmatprep.subr.bf16.mxu1 %v1886_v45 }
  0x4d   :  { %1347 = vmatpush1.bf16.msra.mxu0 %v1859_v18 }
  0x4e   :  { %1349 = vmatprep.subr.bf16.mxu0 %v1862_v19 }
  0x4f   :  { %1107 = vmatpush1.bf16.msra.mxu1 %v1891_v50 }
  0x50   :  { %1109 = vmatprep.subr.bf16.mxu1 %v1894_v52 }
  0x51   :  { %1351 = vmatpush1.bf16.msra.mxu0 %v1867_v28 }
  0x52   :  { %1353 = vmatprep.subr.bf16.mxu0 %v1870_v29 }
  0x53   :  { %1111 = vmatpush1.bf16.msra.mxu1 %v1899_v56 }
  0x54   :  { %1113 = vmatprep.subr.bf16.mxu1 %v1765_v4 }
  0x55   :  { %1355 = vmatpush1.bf16.msra.mxu0 %v1875_v36 }
  0x56   :  { %336 = vmatmul.mubr.f32.vlgmr.msra.gmra.mrb[0].mxu1 %v1713_v0  ;;  %1357 = vmatprep.subr.bf16.mxu0 %v1878_v37 }
  0x57   :  { %1115 = vmatpush1.bf16.msra.mxu1 %v1767_v8 }
  0x58   :  { %1117 = vmatprep.subr.bf16.mxu1 %v1769_v9 }
  0x59   :  { %1359 = vmatpush1.bf16.msra.mxu0 %v1883_v43 }
  0x5a   :  { %1361 = vmatprep.subr.bf16.mxu0 %v1886_v45 }
  0x5b   :  { %1119 = vmatpush1.bf16.msra.mxu1 %v1773_v14 }
  0x5c   :  { %1121 = vmatprep.subr.bf16.mxu1 %v1776_v15 }
  0x5d   :  { %1363 = vmatpush1.bf16.msra.mxu0 %v1891_v50 }
  0x5e   :  { %1365 = vmatprep.subr.bf16.mxu0 %v1894_v52 }
  0x5f   :  { %1123 = vmatpush1.bf16.msra.mxu1 %v1779_v20 }
  0x60   :  { %1125 = vmatprep.subr.bf16.mxu1 %v1782_v21 }
  0x61   :  { %1367 = vmatpush1.bf16.msra.mxu0 %v1899_v56 }
  0x62   :  { %1369 = vmatprep.subr.bf16.mxu0 %v1765_v4 }
  0x63   :  { %1127 = vmatpush1.bf16.msra.mxu1 %v1785_v26 }
  0x64   :  { %1129 = vmatprep.subr.bf16.mxu1 %v1788_v27 }
  0x67   :  { %1131 = vmatpush1.bf16.msra.mxu1 %v1791_v32 }
  0x68   :  { %1133 = vmatprep.subr.bf16.mxu1 %v1794_v33 }
  0x6b   :  { %1135 = vmatpush1.bf16.msra.mxu1 %v1807_v41 }
  0x6c   :  { %1137 = vmatprep.subr.bf16.mxu1 %v1813_v44 }
  0x6f   :  { %1139 = vmatpush1.bf16.msra.mxu1 %v1821_v51 }
  0x70   :  { %1141 = vmatprep.subr.bf16.mxu1 %v1829_v53 }
  0x73   :  { %1143 = vmatpush1.bf16.msra.mxu1 %v1834_v58 }
  0x74   :  { %1145 = vmatprep.subr.bf16.mxu1 %v1838_v59 }
  0x77   :  { %1147 = vmatpush1.bf16.msra.mxu1 %v1843_v1 }
  0x78   :  { %1149 = vmatprep.subr.bf16.mxu1 %v1846_v2 }
  0x7b   :  { %1151 = vmatpush1.bf16.msra.mxu1 %v1851_v10 }
  0x7c   :  { %1153 = vmatprep.subr.bf16.mxu1 %v1854_v11 }
  0x7f   :  { %1155 = vmatpush1.bf16.msra.mxu1 %v1859_v18 }
  0x80   :  { %1157 = vmatprep.subr.bf16.mxu1 %v1862_v19 }
  0x83   :  { %1159 = vmatpush1.bf16.msra.mxu1 %v1867_v28 }
  0x84   :  { %1161 = vmatprep.subr.bf16.mxu1 %v1870_v29 }
  0x87   :  { %1163 = vmatpush1.bf16.msra.mxu1 %v1875_v36 }
  0x88   :  { %1165 = vmatprep.subr.bf16.mxu1 %v1878_v37 }
  0x8b   :  { %1167 = vmatpush1.bf16.msra.mxu1 %v1883_v43 }
  0x8c   :  { %1169 = vmatprep.subr.bf16.mxu1 %v1886_v45 }
  0x8f   :  { %1171 = vmatpush1.bf16.msra.mxu1 %v1891_v50 }
  0x90   :  { %1173 = vmatprep.subr.bf16.mxu1 %v1894_v52 }
  0x93   :  { %1175 = vmatpush1.bf16.msra.mxu1 %v1899_v56 }
  0x94   :  { %1177 = vmatprep.subr.bf16.mxu1 %v1765_v4 }
  0xf7   :  { %v160_v60 = vpop.f32.mrb[0].mxu0 }
  0xf8   :  { %v162_v61 = vpop.f32.mrb[1].mxu0  ;;  %v161_v13 = vadd.f32 %v160_v60, %v1961_v7  ;;  %v42_v60 = vld [vmem:[%s2280_s0 + $0x20] sm:$0xff] }
  0xf9   :  { %v163_v16 = vadd.f32 %v162_v61, %v1963_v12  ;;  %1002 = vmatmul.mubr.msk.f32.gmra.mrb[8].mxu0 %vm62_vm3, %v42_v60 }
  0xfa   :  { %188 = vmatprep.mubr.f32.mxu0 %v1713_v0 }
  0xfe   :  { %v166_v31 = vpop.f32.mrb[2].mxu0 }
  0xff   :  { %v168_v34 = vpop.f32.mrb[3].mxu0  ;;  %v167_v38 = vadd.f32 %v166_v31, %v1961_v7 }
 0x100   :  { %v169_v39 = vadd.f32 %v168_v34, %v1963_v12 }
 0x102   :  { %v172_v54 = vpop.f32.mrb[4].mxu0 }
 0x103   :  { %v174_v55 = vpop.f32.mrb[5].mxu0  ;;  %v173_v61 = vadd.f32 %v172_v54, %v1961_v7 }
 0x104   :  { %v175_v62 = vadd.f32 %v174_v55, %v1963_v12 }
 0x129   :  { %v337_v17 = vpop.f32.mrb[0].mxu1 }
 0x12a   :  { %v342_v22 = vadd.f32 %v337_v17, %v161_v13  ;;  %v339_v23 = vpop.f32.mrb[1].mxu1  ;;  %v178_v17 = vpop.f32.mrb[6].mxu0 }
 0x12b   :  { %v343_v24 = vadd.f32 %v339_v23, %v163_v16  ;;  %v43_v23 = vld [vmem:[%s2280_s0 + $0x28] sm:$0xff] }
 0x12c   :  { %1003 = vmatmul.mubr.msk.f32.gmra.mrb[10].mxu0 %vm62_vm3, %v43_v23  ;;  %v881_v23 = vld [vmem:[%s2284_s4 + $0x50] sm:$0xff] }
 0x12d   :  { %1630 = vtanh.f32 %v343_v24  ;;  %194 = vmatprep.mubr.f32.mxu0 %v1713_v0  ;;  %v44_v24 = vld [vmem:[%s2280_s0 + $0x30] sm:$0xff] }
 0x12e   :  { %1632 = vtanh.f32 %v342_v22  ;;  %v180_v22 = vpop.f32.mrb[7].mxu0 }
 0x12f   :  { %v181_v31 = vadd.f32 %v180_v22, %v1963_v12 }
 0x130   :  { %1004 = vmatmul.mubr.msk.f32.gmra.mrb[12].mxu0 %vm62_vm3, %v44_v24  ;;  %v882_v24 = vld [vmem:[%s2284_s4 + $0x58] sm:$0xff] }
 0x131   :  { %200 = vmatprep.mubr.f32.mxu0 %v1713_v0 }
 0x137   :  { %v1631_v25 = vpop.eup %1630 }
 0x138   :  { %v1633_v30 = vpop.eup %1632  ;;  %410 = vmatprep.mubr.f32.mxu1 %v1631_v25  ;;  %v45_v25 = vld [vmem:[%s2280_s0 + $0x38] sm:$0xff] }
 0x139   :  { %411 = vmatmul.mubr.f32.vlgmr.msra.gmra.mrb[2].mxu1 %v1633_v30  ;;  %1005 = vmatmul.mubr.msk.f32.gmra.mrb[14].mxu0 %vm62_vm3, %v45_v25  ;;  %v179_v30 = vadd.f32 %v178_v17, %v1961_v7  ;;  %v898_v17 = vld [vmem:[%s2284_s4 + $0xd8] sm:$0xff]  ;;  %v1582_v25 = vpack.c.bf16 %v882_v24, %v881_v23 }
 0x13a   :  { %1179 = vmatpush1.bf16.msra.mxu1 %v1767_v8 }
 0x13b   :  { %1181 = vmatprep.subr.bf16.mxu1 %v1769_v9 }
 0x13e   :  { %1183 = vmatpush1.bf16.msra.mxu1 %v1773_v14 }
 0x13f   :  { %1185 = vmatprep.subr.bf16.mxu1 %v1776_v15 }
 0x142   :  { %1187 = vmatpush1.bf16.msra.mxu1 %v1779_v20 }
 0x143   :  { %1189 = vmatprep.subr.bf16.mxu1 %v1782_v21 }
 0x146   :  { %1191 = vmatpush1.bf16.msra.mxu1 %v1785_v26 }
 0x147   :  { %1193 = vmatprep.subr.bf16.mxu1 %v1788_v27 }
 0x14a   :  { %1195 = vmatpush1.bf16.msra.mxu1 %v1791_v32 }
 0x14b   :  { %1197 = vmatprep.subr.bf16.mxu1 %v1794_v33 }
 0x14e   :  { %1199 = vmatpush1.bf16.msra.mxu1 %v1807_v41 }
 0x14f   :  { %1201 = vmatprep.subr.bf16.mxu1 %v1813_v44 }
 0x152   :  { %1203 = vmatpush1.bf16.msra.mxu1 %v1821_v51 }
 0x153   :  { %1205 = vmatprep.subr.bf16.mxu1 %v1829_v53 }
 0x156   :  { %1207 = vmatpush1.bf16.msra.mxu1 %v1834_v58 }
 0x157   :  { %1209 = vmatprep.subr.bf16.mxu1 %v1838_v59 }
 0x15a   :  { %1211 = vmatpush1.bf16.msra.mxu1 %v1843_v1 }
 0x15b   :  { %1213 = vmatprep.subr.bf16.mxu1 %v1846_v2 }
 0x15e   :  { %1215 = vmatpush1.bf16.msra.mxu1 %v1851_v10 }
 0x15f   :  { %1217 = vmatprep.subr.bf16.mxu1 %v1854_v11 }
 0x162   :  { %1219 = vmatpush1.bf16.msra.mxu1 %v1859_v18 }
 0x163   :  { %1221 = vmatprep.subr.bf16.mxu1 %v1862_v19 }
 0x166   :  { %1223 = vmatpush1.bf16.msra.mxu1 %v1867_v28 }
 0x167   :  { %1225 = vmatprep.subr.bf16.mxu1 %v1870_v29 }
 0x16a   :  { %1227 = vmatpush1.bf16.msra.mxu1 %v1875_v36 }
 0x16b   :  { %1229 = vmatprep.subr.bf16.mxu1 %v1878_v37 }
 0x16e   :  { %1231 = vmatpush1.bf16.msra.mxu1 %v1883_v43 }
 0x16f   :  { %1233 = vmatprep.subr.bf16.mxu1 %v1886_v45 }
 0x172   :  { %1235 = vmatpush1.bf16.msra.mxu1 %v1891_v50 }
 0x173   :  { %1237 = vmatprep.subr.bf16.mxu1 %v1894_v52 }
 0x176   :  { %1239 = vmatpush1.bf16.msra.mxu1 %v1899_v56 }
 0x177   :  { %1241 = vmatprep.subr.bf16.mxu1 %v1765_v4 }
 0x20c   :  { %v412_v40 = vpop.f32.mrb[2].mxu1 }
 0x20d   :  { %v417_v42 = vadd.f32 %v412_v40, %v167_v38  ;;  %v414_v46 = vpop.f32.mrb[3].mxu1 }
 0x20e   :  { %v418_v47 = vadd.f32 %v414_v46, %v169_v39 }
 0x210   :  { %1634 = vtanh.f32 %v418_v47 }
 0x211   :  { %1636 = vtanh.f32 %v417_v42 }
 0x21a   :  { %v1635_v48 = vpop.eup %1634 }
 0x21b   :  { %v1637_v49 = vpop.eup %1636  ;;  %485 = vmatprep.mubr.f32.mxu1 %v1635_v48 }
 0x21c   :  { %486 = vmatmul.mubr.f32.vlgmr.msra.gmra.mrb[4].mxu1 %v1637_v49 }
 0x21d   :  { %1243 = vmatpush1.bf16.msra.mxu1 %v1767_v8 }
 0x21e   :  { %1245 = vmatprep.subr.bf16.mxu1 %v1769_v9 }
 0x221   :  { %1247 = vmatpush1.bf16.msra.mxu1 %v1773_v14 }
 0x222   :  { %1249 = vmatprep.subr.bf16.mxu1 %v1776_v15 }
 0x225   :  { %1251 = vmatpush1.bf16.msra.mxu1 %v1779_v20 }
 0x226   :  { %1253 = vmatprep.subr.bf16.mxu1 %v1782_v21 }
 0x229   :  { %1255 = vmatpush1.bf16.msra.mxu1 %v1785_v26 }
 0x22a   :  { %1257 = vmatprep.subr.bf16.mxu1 %v1788_v27 }
 0x22d   :  { %1259 = vmatpush1.bf16.msra.mxu1 %v1791_v32 }
 0x22e   :  { %1261 = vmatprep.subr.bf16.mxu1 %v1794_v33 }
 0x231   :  { %1263 = vmatpush1.bf16.msra.mxu1 %v1807_v41 }
 0x232   :  { %1265 = vmatprep.subr.bf16.mxu1 %v1813_v44 }
 0x235   :  { %1267 = vmatpush1.bf16.msra.mxu1 %v1821_v51 }
 0x236   :  { %1269 = vmatprep.subr.bf16.mxu1 %v1829_v53 }
 0x239   :  { %1271 = vmatpush1.bf16.msra.mxu1 %v1834_v58 }
 0x23a   :  { %1273 = vmatprep.subr.bf16.mxu1 %v1838_v59 }
 0x23d   :  { %1275 = vmatpush1.bf16.msra.mxu1 %v1843_v1 }
 0x23e   :  { %1277 = vmatprep.subr.bf16.mxu1 %v1846_v2 }
 0x241   :  { %1279 = vmatpush1.bf16.msra.mxu1 %v1851_v10 }
 0x242   :  { %1281 = vmatprep.subr.bf16.mxu1 %v1854_v11 }
 0x245   :  { %1283 = vmatpush1.bf16.msra.mxu1 %v1859_v18 }
 0x246   :  { %1285 = vmatprep.subr.bf16.mxu1 %v1862_v19 }
 0x249   :  { %1287 = vmatpush1.bf16.msra.mxu1 %v1867_v28 }
 0x24a   :  { %1289 = vmatprep.subr.bf16.mxu1 %v1870_v29 }
 0x24d   :  { %1291 = vmatpush1.bf16.msra.mxu1 %v1875_v36 }
 0x24e   :  { %1293 = vmatprep.subr.bf16.mxu1 %v1878_v37 }
 0x251   :  { %1295 = vmatpush1.bf16.msra.mxu1 %v1883_v43 }
 0x252   :  { %1297 = vmatprep.subr.bf16.mxu1 %v1886_v45 }
 0x255   :  { %1299 = vmatpush1.bf16.msra.mxu1 %v1891_v50 }
 0x256   :  { %1301 = vmatprep.subr.bf16.mxu1 %v1894_v52 }
 0x259   :  { %1303 = vmatpush1.bf16.msra.mxu1 %v1899_v56 }
 0x2ef   :  { %v487_v63 = vpop.f32.mrb[4].mxu1 }
 0x2f0   :  { %v492_v3 = vadd.f32 %v487_v63, %v173_v61  ;;  %v489_v5 = vpop.f32.mrb[5].mxu1 }
 0x2f1   :  { %v493_v6 = vadd.f32 %v489_v5, %v175_v62  ;;  %v879_v5 = vld [vmem:[%s2284_s4 + $0x40] sm:$0xff] }
 0x2f3   :  { %1638 = vtanh.f32 %v493_v6  ;;  %v880_v6 = vld [vmem:[%s2284_s4 + $0x48] sm:$0xff] }
 0x2f4   :  { %1640 = vtanh.f32 %v492_v3 }
 0x2fd   :  { %v1639_v13 = vpop.eup %1638 }
 0x2fe   :  { %v1641_v16 = vpop.eup %1640  ;;  %560 = vmatprep.mubr.f32.mxu1 %v1639_v13  ;;  %v1578_v13 = vpack.c.bf16 %v880_v6, %v879_v5 }
 0x2ff   :  { %561 = vmatmul.mubr.f32.vlgmr.msra.gmra.mrb[6].mxu1 %v1641_v16  ;;  %v897_v16 = vld [vmem:[%s2284_s4 + $0xd0] sm:$0xff] }
 0x300   :  { %v1580_v22 = vpack.c.bf16 %v898_v17, %v897_v16 }
 0x3d2   :  { %v562_v34 = vpop.f32.mrb[6].mxu1 }
 0x3d3   :  { %v567_v35 = vadd.f32 %v562_v34, %v179_v30  ;;  %v564_v38 = vpop.f32.mrb[7].mxu1  ;;  %v899_v30 = vld [vmem:[%s2284_s4 + $0xe0] sm:$0xff] }
 0x3d4   :  { %v568_v39 = vadd.f32 %v564_v38, %v181_v31  ;;  %v900_v31 = vld [vmem:[%s2284_s4 + $0xe8] sm:$0xff]  ;;  %v883_v34 = vld [vmem:[%s2284_s4 + $0x60] sm:$0xff] }
 0x3d5   :  { %v884_v38 = vld [vmem:[%s2284_s4 + $0x68] sm:$0xff] }
 0x3d6   :  { %1642 = vtanh.f32 %v568_v39  ;;  %v901_v39 = vld [vmem:[%s2284_s4 + $0xf0] sm:$0xff] }
 0x3d7   :  { %1644 = vtanh.f32 %v567_v35  ;;  %v1584_v35 = vpack.c.bf16 %v900_v31, %v899_v30 }
 0x3e0   :  { %v1643_v40 = vpop.eup %1642 }
 0x3e1   :  { %v1645_v42 = vpop.eup %1644  ;;  %635 = vmatprep.mubr.f32.mxu0 %v1643_v40  ;;  %v902_v40 = vld [vmem:[%s2284_s4 + $0xf8] sm:$0xff] }
 0x3e2   :  { %636 = vmatmul.mubr.f32.vlgmr.msra.gmra.mrb[8].mxu0 %v1645_v42  ;;  %v1586_v42 = vpack.c.bf16 %v884_v38, %v883_v34 }
 0x3e3   :  { %1371 = vmatpush1.bf16.msra.mxu0 %v1767_v8 }
 0x3e4   :  { %1373 = vmatprep.subr.bf16.mxu0 %v1769_v9 }
 0x3e7   :  { %1375 = vmatpush1.bf16.msra.mxu0 %v1773_v14 }
 0x3e8   :  { %1377 = vmatprep.subr.bf16.mxu0 %v1776_v15 }
 0x3eb   :  { %1379 = vmatpush1.bf16.msra.mxu0 %v1779_v20 }
 0x3ec   :  { %1381 = vmatprep.subr.bf16.mxu0 %v1782_v21 }
 0x3ef   :  { %1383 = vmatpush1.bf16.msra.mxu0 %v1785_v26 }
 0x3f0   :  { %1385 = vmatprep.subr.bf16.mxu0 %v1788_v27 }
 0x3f3   :  { %1387 = vmatpush1.bf16.msra.mxu0 %v1791_v32 }
 0x3f4   :  { %1389 = vmatprep.subr.bf16.mxu0 %v1794_v33 }
 0x3f7   :  { %1391 = vmatpush1.bf16.msra.mxu0 %v1807_v41 }
 0x3f8   :  { %1393 = vmatprep.subr.bf16.mxu0 %v1813_v44 }
 0x3fb   :  { %1395 = vmatpush1.bf16.msra.mxu0 %v1821_v51 }
 0x3fc   :  { %1397 = vmatprep.subr.bf16.mxu0 %v1829_v53 }
 0x3ff   :  { %1399 = vmatpush1.bf16.msra.mxu0 %v1834_v58 }
 0x400   :  { %1401 = vmatprep.subr.bf16.mxu0 %v1838_v59 }
 0x403   :  { %1403 = vmatpush1.bf16.msra.mxu0 %v1843_v1 }
 0x404   :  { %1405 = vmatprep.subr.bf16.mxu0 %v1846_v2 }
 0x407   :  { %1407 = vmatpush1.bf16.msra.mxu0 %v1851_v10 }
 0x408   :  { %1409 = vmatprep.subr.bf16.mxu0 %v1854_v11 }
 0x40b   :  { %1411 = vmatpush1.bf16.msra.mxu0 %v1859_v18 }
 0x40c   :  { %1413 = vmatprep.subr.bf16.mxu0 %v1862_v19 }
 0x40f   :  { %1415 = vmatpush1.bf16.msra.mxu0 %v1867_v28 }
 0x410   :  { %1417 = vmatprep.subr.bf16.mxu0 %v1870_v29 }
 0x413   :  { %1419 = vmatpush1.bf16.msra.mxu0 %v1875_v36 }
 0x414   :  { %1421 = vmatprep.subr.bf16.mxu0 %v1878_v37 }
 0x417   :  { %1423 = vmatpush1.bf16.msra.mxu0 %v1883_v43 }
 0x418   :  { %1425 = vmatprep.subr.bf16.mxu0 %v1886_v45 }
 0x41b   :  { %1427 = vmatpush1.bf16.msra.mxu0 %v1891_v50 }
 0x41c   :  { %1429 = vmatprep.subr.bf16.mxu0 %v1894_v52 }
 0x41f   :  { %1431 = vmatpush1.bf16.msra.mxu0 %v1899_v56 }
 0x420   :  { %1433 = vmatprep.subr.bf16.mxu0 %v1765_v4 }
 0x4b5   :  { %v637_v0 = vpop.f32.mrb[8].mxu0 }
 0x4b6   :  { %v1608_v46 = vadd.f32 %v637_v0, %v1961_v7  ;;  %v639_v47 = vpop.f32.mrb[9].mxu0  ;;  %v1588_v0 = vpack.c.bf16 %v902_v40, %v901_v39 }
 0x4b7   :  { %v1609_v48 = vadd.f32 %v639_v47, %v1963_v12  ;;  %v886_v47 = vld [vmem:[%s2284_s4 + $0x78] sm:$0xff] }
 0x4b9   :  { %1646 = vtanh.f32 %v1609_v48 }
 0x4ba   :  { %1648 = vtanh.f32 %v1608_v46  ;;  %v885_v46 = vld [vmem:[%s2284_s4 + $0x70] sm:$0xff] }
 0x4bb   :  { %v1590_v48 = vpack.c.bf16 %v886_v47, %v885_v46 }
 0x4c3   :  { %v1647_v49 = vpop.eup %1646 }
 0x4c4   :  { %v1649_v54 = vpop.eup %1648  ;;  %710 = vmatprep.mubr.f32.mxu0 %v1647_v49 }
 0x4c5   :  { %711 = vmatmul.mubr.f32.vlgmr.msra.gmra.mrb[10].mxu0 %v1649_v54 }
 0x4c6   :  { %1435 = vmatpush1.bf16.msra.mxu0 %v1767_v8 }
 0x4c7   :  { %1437 = vmatprep.subr.bf16.mxu0 %v1769_v9 }
 0x4ca   :  { %1439 = vmatpush1.bf16.msra.mxu0 %v1773_v14 }
 0x4cb   :  { %1441 = vmatprep.subr.bf16.mxu0 %v1776_v15 }
 0x4ce   :  { %1443 = vmatpush1.bf16.msra.mxu0 %v1779_v20 }
 0x4cf   :  { %1445 = vmatprep.subr.bf16.mxu0 %v1782_v21 }
 0x4d2   :  { %1447 = vmatpush1.bf16.msra.mxu0 %v1785_v26 }
 0x4d3   :  { %1449 = vmatprep.subr.bf16.mxu0 %v1788_v27 }
 0x4d6   :  { %1451 = vmatpush1.bf16.msra.mxu0 %v1791_v32 }
 0x4d7   :  { %1453 = vmatprep.subr.bf16.mxu0 %v1794_v33 }
 0x4da   :  { %1455 = vmatpush1.bf16.msra.mxu0 %v1807_v41 }
 0x4db   :  { %1457 = vmatprep.subr.bf16.mxu0 %v1813_v44 }
 0x4de   :  { %1459 = vmatpush1.bf16.msra.mxu0 %v1821_v51 }
 0x4df   :  { %1461 = vmatprep.subr.bf16.mxu0 %v1829_v53 }
 0x4e2   :  { %1463 = vmatpush1.bf16.msra.mxu0 %v1834_v58 }
 0x4e3   :  { %1465 = vmatprep.subr.bf16.mxu0 %v1838_v59 }
 0x4e6   :  { %1467 = vmatpush1.bf16.msra.mxu0 %v1843_v1 }
 0x4e7   :  { %1469 = vmatprep.subr.bf16.mxu0 %v1846_v2 }
 0x4ea   :  { %1471 = vmatpush1.bf16.msra.mxu0 %v1851_v10 }
 0x4eb   :  { %1473 = vmatprep.subr.bf16.mxu0 %v1854_v11 }
 0x4ee   :  { %1475 = vmatpush1.bf16.msra.mxu0 %v1859_v18 }
 0x4ef   :  { %1477 = vmatprep.subr.bf16.mxu0 %v1862_v19 }
 0x4f2   :  { %1479 = vmatpush1.bf16.msra.mxu0 %v1867_v28 }
 0x4f3   :  { %1481 = vmatprep.subr.bf16.mxu0 %v1870_v29 }
 0x4f6   :  { %1483 = vmatpush1.bf16.msra.mxu0 %v1875_v36 }
 0x4f7   :  { %1485 = vmatprep.subr.bf16.mxu0 %v1878_v37 }
 0x4fa   :  { %1487 = vmatpush1.bf16.msra.mxu0 %v1883_v43 }
 0x4fb   :  { %1489 = vmatprep.subr.bf16.mxu0 %v1886_v45 }
 0x4fe   :  { %1491 = vmatpush1.bf16.msra.mxu0 %v1891_v50 }
 0x4ff   :  { %1493 = vmatprep.subr.bf16.mxu0 %v1894_v52 }
 0x502   :  { %1495 = vmatpush1.bf16.msra.mxu0 %v1899_v56 }
 0x503   :  { %1497 = vmatprep.subr.bf16.mxu0 %v1765_v4  ;;  %v887_v4 = vld [vmem:[%s2284_s4 + $0x80] sm:$0xff] }
 0x598   :  { %v712_v55 = vpop.f32.mrb[10].mxu0 }
 0x599   :  { %v1610_v57 = vadd.f32 %v712_v55, %v1961_v7  ;;  %v714_v60 = vpop.f32.mrb[11].mxu0 }
 0x59a   :  { %v1611_v61 = vadd.f32 %v714_v60, %v1963_v12 }
 0x59c   :  { %1650 = vtanh.f32 %v1611_v61 }
 0x59d   :  { %1652 = vtanh.f32 %v1610_v57 }
 0x5a6   :  { %v1651_v62 = vpop.eup %1650 }
 0x5a7   :  { %v1653_v63 = vpop.eup %1652  ;;  %785 = vmatprep.mubr.f32.mxu0 %v1651_v62 }
 0x5a8   :  { %786 = vmatmul.mubr.f32.vlgmr.msra.gmra.mrb[12].mxu0 %v1653_v63  ;;  %v1006_v63 = vld [vmem:[%s2285_s5] ss:$0 sm:$0xff] }
 0x5a9   :  { %1499 = vmatpush1.bf16.msra.mxu0 %v1767_v8  ;;  %v888_v8 = vld [vmem:[%s2284_s4 + $0x88] sm:$0xff] }
 0x5aa   :  { %1501 = vmatprep.subr.bf16.mxu0 %v1769_v9  ;;  %v871_v9 = vld [vmem:[%s2284_s4] sm:$0xff] }
 0x5ad   :  { %1503 = vmatpush1.bf16.msra.mxu0 %v1773_v14  ;;  %v1560_v14 = vpack.c.bf16 %v888_v8, %v887_v4 }
 0x5ae   :  { %1505 = vmatprep.subr.bf16.mxu0 %v1776_v15  ;;  %v872_v15 = vld [vmem:[%s2284_s4 + $0x8] sm:$0xff] }
 0x5af   :  { %1561 = vmatprep.subr.bf16.mxu1 %v1560_v14 }
 0x5b1   :  { %1507 = vmatpush1.bf16.msra.mxu0 %v1779_v20  ;;  %v889_v20 = vld [vmem:[%s2284_s4 + $0x90] sm:$0xff] }
 0x5b2   :  { %1509 = vmatprep.subr.bf16.mxu0 %v1782_v21  ;;  %v890_v21 = vld [vmem:[%s2284_s4 + $0x98] sm:$0xff] }
 0x5b5   :  { %1511 = vmatpush1.bf16.msra.mxu0 %v1785_v26  ;;  %v1562_v26 = vpack.c.bf16 %v872_v15, %v871_v9 }
 0x5b6   :  { %1513 = vmatprep.subr.bf16.mxu0 %v1788_v27  ;;  %v1564_v27 = vpack.c.bf16 %v890_v21, %v889_v20 }
 0x5b7   :  { %1563 = vmatpush3.bf16.msra.mxu1 %v1562_v26 }
 0x5b8   :  { %1565 = vmatprep.subr.bf16.mxu1 %v1564_v27 }
 0x5b9   :  { %1515 = vmatpush1.bf16.msra.mxu0 %v1791_v32  ;;  %v873_v32 = vld [vmem:[%s2284_s4 + $0x10] sm:$0xff] }
 0x5ba   :  { %1517 = vmatprep.subr.bf16.mxu0 %v1794_v33  ;;  %v874_v33 = vld [vmem:[%s2284_s4 + $0x18] sm:$0xff] }
 0x5bd   :  { %1519 = vmatpush1.bf16.msra.mxu0 %v1807_v41  ;;  %v891_v41 = vld [vmem:[%s2284_s4 + $0xa0] sm:$0xff] }
 0x5be   :  { %1521 = vmatprep.subr.bf16.mxu0 %v1813_v44  ;;  %v892_v44 = vld [vmem:[%s2284_s4 + $0xa8] sm:$0xff] }
 0x5c1   :  { %1523 = vmatpush1.bf16.msra.mxu0 %v1821_v51  ;;  %v1566_v51 = vpack.c.bf16 %v874_v33, %v873_v32 }
 0x5c2   :  { %1525 = vmatprep.subr.bf16.mxu0 %v1829_v53  ;;  %v1568_v53 = vpack.c.bf16 %v892_v44, %v891_v41 }
 0x5c3   :  { %1567 = vmatpush3.bf16.msra.mxu1 %v1566_v51 }
 0x5c4   :  { %1569 = vmatprep.subr.bf16.mxu1 %v1568_v53 }
 0x5c5   :  { %1527 = vmatpush1.bf16.msra.mxu0 %v1834_v58  ;;  %v875_v58 = vld [vmem:[%s2284_s4 + $0x20] sm:$0xff] }
 0x5c6   :  { %1529 = vmatprep.subr.bf16.mxu0 %v1838_v59  ;;  %v876_v59 = vld [vmem:[%s2284_s4 + $0x28] sm:$0xff] }
 0x5c9   :  { %1531 = vmatpush1.bf16.msra.mxu0 %v1843_v1  ;;  %v893_v1 = vld [vmem:[%s2284_s4 + $0xb0] sm:$0xff] }
 0x5ca   :  { %1533 = vmatprep.subr.bf16.mxu0 %v1846_v2  ;;  %v894_v2 = vld [vmem:[%s2284_s4 + $0xb8] sm:$0xff] }
 0x5cd   :  { %1535 = vmatpush1.bf16.msra.mxu0 %v1851_v10  ;;  %v1570_v10 = vpack.c.bf16 %v876_v59, %v875_v58 }
 0x5ce   :  { %1537 = vmatprep.subr.bf16.mxu0 %v1854_v11  ;;  %v1572_v11 = vpack.c.bf16 %v894_v2, %v893_v1 }
 0x5cf   :  { %1571 = vmatpush3.bf16.msra.mxu1 %v1570_v10 }
 0x5d0   :  { %1573 = vmatprep.subr.bf16.mxu1 %v1572_v11 }
 0x5d1   :  { %1539 = vmatpush1.bf16.msra.mxu0 %v1859_v18  ;;  %v877_v18 = vld [vmem:[%s2284_s4 + $0x30] sm:$0xff] }
 0x5d2   :  { %1541 = vmatprep.subr.bf16.mxu0 %v1862_v19  ;;  %v878_v19 = vld [vmem:[%s2284_s4 + $0x38] sm:$0xff] }
 0x5d5   :  { %1543 = vmatpush1.bf16.msra.mxu0 %v1867_v28  ;;  %v1574_v28 = vpack.c.bf16 %v878_v19, %v877_v18 }
 0x5d6   :  { %1545 = vmatprep.subr.bf16.mxu0 %v1870_v29 }
 0x5d7   :  { %1575 = vmatpush3.bf16.msra.mxu1 %v1574_v28 }
 0x5d9   :  { %1547 = vmatpush1.bf16.msra.mxu0 %v1875_v36 }
 0x5da   :  { %1549 = vmatprep.subr.bf16.mxu0 %v1878_v37 }
 0x5dd   :  { %1551 = vmatpush1.bf16.msra.mxu0 %v1883_v43 }
 0x5de   :  { %1553 = vmatprep.subr.bf16.mxu0 %v1886_v45 }
 0x5e1   :  { %1555 = vmatpush1.bf16.msra.mxu0 %v1891_v50 }
 0x5e2   :  { %1557 = vmatprep.subr.bf16.mxu0 %v1894_v52  ;;  %v895_v52 = vld [vmem:[%s2284_s4 + $0xc0] sm:$0xff] }
 0x5e5   :  { %1559 = vmatpush1.bf16.msra.mxu0 %v1899_v56  ;;  %v896_v56 = vld [vmem:[%s2284_s4 + $0xc8] sm:$0xff] }
 0x5e6   :  { %v1576_v3 = vpack.c.bf16 %v896_v56, %v895_v52 }
 0x5e8   :  { %1577 = vmatprep.subr.bf16.mxu1 %v1576_v3 }
 0x5e9   :  { %1579 = vmatpush3.bf16.msra.mxu1 %v1578_v13 }
 0x5ea   :  { %1581 = vmatprep.subr.bf16.mxu1 %v1580_v22 }
 0x5ed   :  { %1583 = vmatpush3.bf16.msra.mxu1 %v1582_v25 }
 0x5ee   :  { %1585 = vmatprep.subr.bf16.mxu1 %v1584_v35 }
 0x5f1   :  { %1587 = vmatpush3.bf16.msra.mxu1 %v1586_v42 }
 0x5f2   :  { %1589 = vmatprep.subr.bf16.mxu1 %v1588_v0 }
 0x5f5   :  { %1591 = vmatpush3.bf16.msra.mxu1 %v1590_v48 }
 0x67b   :  { %v787_v29 = vpop.f32.mrb[12].mxu0 }
 0x67c   :  { %v1612_v36 = vadd.f32 %v787_v29, %v1961_v7  ;;  %v789_v37 = vpop.f32.mrb[13].mxu0 }
 0x67d   :  { %v1613_v43 = vadd.f32 %v789_v37, %v1963_v12 }
 0x67f   :  { %1654 = vtanh.f32 %v1613_v43 }
 0x680   :  { %1656 = vtanh.f32 %v1612_v36 }
 0x689   :  { %v1655_v45 = vpop.eup %1654 }
 0x68a   :  { %v1657_v50 = vpop.eup %1656  ;;  %860 = vmatprep.mubr.f32.mxu0 %v1655_v45 }
 0x68b   :  { %861 = vmatmul.mubr.f32.vlgmr.msra.gmra.mrb[14].mxu0 %v1657_v50 }
 0x75e   :  { %v862_v49 = vpop.f32.mrb[14].mxu0 }
 0x75f   :  { %v1614_v54 = vadd.f32 %v862_v49, %v1961_v7  ;;  %v864_v55 = vpop.f32.mrb[15].mxu0 }
 0x760   :  { %v1615_v57 = vadd.f32 %v864_v55, %v1963_v12 }
 0x762   :  { %1658 = vtanh.f32 %v1615_v57 }
 0x763   :  { %1660 = vtanh.f32 %v1614_v54 }
 0x76c   :  { %v1659_v60 = vpop.eup %1658 }
 0x76d   :  { %v1661_v61 = vpop.eup %1660  ;;  %974 = vmatprep.mubr.f32.mxu1 %v1659_v60 }
 0x76e   :  { %975 = vmatmul.mubr.f32.vlgmr.msra.gmra.mrb[8].mxu1 %v1661_v61 }
 0x841   :  { %v1039_v62 = vpop.f32.mrb[8].mxu1 }
 0x842   :  { %v1040_v4 = vpop.f32.mrb[9].mxu1 }
 0x843   :  { %v1041_v8 = vadd.f32 %v1040_v4, %v1039_v62 }
 0x845   :  { %v977_v9 = vadd.f32 %v1041_v8, %v1006_v63 }
 0x847   :  { %980 = vst.msk [vmem:[#allocation5] sm:$0xff] %vm62_vm3, %v977_v9 }
 0x848   :  { %1695 = shalt.err (!%p1692_p12)
}
 0x849   :  { %s1696_s21 = scalar_lea.hbm %s2286_s6, 128 }
 0x84a   :  { %p1697_p13 = scmp.ne.s32.totalorder %s2286_s6, %s1696_s21  ;;  %p1700_p0 = scmp.lt.u32.totalorder %s1696_s21, %s2286_s6 }
 0x84c   :  { %p1702_p1 = pnand %p1700_p0, %p1697_p13 }
 0x84e   :  { %1705 = shalt.err (!%p1702_p1)
}
 0x84f   :  { %990 = dma.vmem_to_hbm [thread:$0]  %s988_s18, 128, %s2286_s6, [#allocation4]  }
 0x850   :  { %1708 = dma.done.wait [#allocation4], 128  }
 0x851   :  { %1709 = vsyncadd [#allocation4], 4294967168 }
 0x852   :  { %994 = vsyncpa [#allocation3], 1 }
 0x853   :  { %995 = vsyncpa [#allocation4], 1 }

</bundles_post_ra>
